<compile_context>
chip_gen: v5e
topology: v5e:2x2
jax: 0.10.0
libtpu: 0.0.40
codegen_flags: <defaults>
</compile_context>

<pallas_src>
import jax
import jax.numpy as jnp
from jax.experimental import pallas as pl
from jax.experimental.pallas import tpu as pltpu


def _round_up(x, m):
    return (x + m - 1) // m * m


def _semiemb_kernel(x_ref, w_ref, b_ref, o_ref):
    # x_ref: (TN, C_in)   w_ref: (C_in, C_out_p)   b_ref: (1, C_out_p)
    # o_ref: (TN, C_out_p)
    x = x_ref[...].astype(w_ref.dtype)
    logits = jnp.dot(x, w_ref[...], preferred_element_type=jnp.float32)
    logits = logits + b_ref[...]                      # f32 bias (pad lanes = -1e30)
    # Numerically stable log_softmax over dim=1 (last axis), all in f32.
    m = jnp.max(logits, axis=-1, keepdims=True)
    shifted = logits - m
    lse = jnp.log(jnp.sum(jnp.exp(shifted), axis=-1, keepdims=True))
    o_ref[...] = (shifted - lse).astype(o_ref.dtype)


def semiemb_prepare(weight, bias, *, compute_dtype=jnp.bfloat16,
                    lane_pad_threshold=512):
    """One-time parameter prep: transposed (+cast, +lane-padded) weight, 2-D bias."""
    c_out, c_in = weight.shape
    c_out_p = _round_up(c_out, 128) if c_out >= lane_pad_threshold else c_out
    w_t = weight.T.astype(compute_dtype)              # (C_in, C_out[_p])
    b = bias.astype(jnp.float32)
    if c_out_p != c_out:
        w_t = jnp.pad(w_t, ((0, 0), (0, c_out_p - c_out)))
        # Pad lanes get logit = 0 (zero W columns) + (-1e30) and thus drop out
        # of the row max / sum-exp automatically; no in-kernel masking needed.
        b = jnp.pad(b, (0, c_out_p - c_out), constant_values=-1e30)
    return w_t, b.reshape(1, c_out_p), c_out


def _choose_tile(n, tile_n, c_out_p):
    if n <= 8:
        return n                                      # block dim == full array dim
    # Keep one f32 out tile under ~8 MiB so double buffers + temporaries fit.
    cap = max(8, ((8 * 1024 * 1024) // (c_out_p * 4)) // 8 * 8)
    tile = max(8, _round_up(min(tile_n, _round_up(n, 8), cap), 8))
    if pl.cdiv(n, tile) < 2:
        # >= 2 grid steps so the "parallel" axis can use both v7x TensorCores.
        tile = max(8, _round_up(pl.cdiv(n, 2), 8))
    return tile


def _vmem_limit_bytes(tile, c_in, c_out_p, x_itemsize, w_itemsize, out_itemsize):
    needed = (2 * tile * c_in * x_itemsize            # double-buffered x tiles
              + c_in * c_out_p * w_itemsize           # single-buffered weight
              + 2 * c_out_p * 4                       # bias
              + 2 * tile * c_out_p * out_itemsize     # double-buffered out tiles
              + 4 * tile * c_out_p * 4)               # f32 logits / softmax temps
    try:  # 0.8x physical VMEM: ~102 MiB on v5e/v6e, ~51 MiB on v7x
        cap = int(pltpu.get_tpu_info().vmem_capacity_bytes * 0.8)
    except Exception:
        cap = 48 * 1024 * 1024                        # safe even on 64-MiB v7x
    return int(min(max(2 * needed, 32 * 1024 * 1024), cap))


def semiemb_apply(x, w_t, bias2d, c_out, *, tile_n=512, out_dtype=None):
    """x: [N, C_in] -> log_softmax(x @ W.T + b, axis=1): [N, c_out]."""
    n, c_in = x.shape
    c_in_w, c_out_p = w_t.shape
    assert c_in_w == c_in, (c_in_w, c_in)
    out_dtype = x.dtype if out_dtype is None else jnp.dtype(out_dtype)

    tile = _choose_tile(n, tile_n, c_out_p)
    grid = (pl.cdiv(n, tile),)

    cost = pl.CostEstimate(
        flops=2 * n * c_in * c_out_p,
        transcendentals=n * c_out_p + n,              # exp per logit + log per row
        bytes_accessed=(n * c_in * x.dtype.itemsize
                        + int(w_t.size) * w_t.dtype.itemsize
                        + int(bias2d.size) * 4
                        + n * c_out_p * jnp.dtype(out_dtype).itemsize),
    )

    out = pl.pallas_call(
        _semiemb_kernel,
        out_shape=jax.ShapeDtypeStruct((n, c_out_p), out_dtype),
        grid_spec=pltpu.PrefetchScalarGridSpec(
            num_scalar_prefetch=0,
            grid=grid,
            in_specs=[
                pl.BlockSpec((tile, c_in), lambda i: (i, 0)),
                # Constant-index blocks: single-buffer (no re-DMA across steps).
                pl.BlockSpec((c_in, c_out_p), lambda i: (0, 0),
                             pipeline_mode=pl.Buffered(1)),
                pl.BlockSpec((1, c_out_p), lambda i: (0, 0),
                             pipeline_mode=pl.Buffered(1)),
            ],
            out_specs=pl.BlockSpec((tile, c_out_p), lambda i: (i, 0)),
        ),
        compiler_params=pltpu.CompilerParams(
            dimension_semantics=("parallel",),        # megacore-shard rows on v7x
            vmem_limit_bytes=_vmem_limit_bytes(
                tile, c_in, c_out_p, x.dtype.itemsize, w_t.dtype.itemsize,
                jnp.dtype(out_dtype).itemsize),
        ),
        cost_estimate=cost,
    )(x, w_t, bias2d)

    return out if c_out_p == c_out else out[:, :c_out]


def semiemb_forward(x, weight, bias, *, compute_dtype=jnp.bfloat16, tile_n=512,
                    out_dtype=None):
    """Convenience one-shot entry point (prefer prepare() once + apply() per call)."""
    w_t, b2, c_out = semiemb_prepare(weight, bias, compute_dtype=compute_dtype)
    return semiemb_apply(x, w_t, b2, c_out, tile_n=tile_n, out_dtype=out_dtype)


def reference_forward(x, weight, bias):
    logits = x @ weight.T + bias
    return jax.nn.log_softmax(logits, axis=1)


if __name__ == "__main__":
    key = jax.random.PRNGKey(0)
    k_x, k_w, k_b, k_x2 = jax.random.split(key, 4)

    N, C_in, C_out = 16, 32, 16   # small shapes consistent with Linear(in, out)

    # Deterministic init (mimics nn.Linear uniform(-1/sqrt(in), 1/sqrt(in))).
    bound = 1.0 / (C_in ** 0.5)
    weight = jax.random.uniform(k_w, (C_out, C_in), jnp.float32, -bound, bound)
    bias = jax.random.uniform(k_b, (C_out,), jnp.float32, -bound, bound)
    x = jax.random.normal(k_x, (N, C_in), jnp.float32)

    ref = reference_forward(x, weight, bias)

    # Strict-accuracy check: f32 matmul path (prepare once, apply per forward).
    w32, b32, co = semiemb_prepare(weight, bias, compute_dtype=jnp.float32)
    out_f32 = jax.block_until_ready(semiemb_apply(x, w32, b32, co))
    assert out_f32.shape == (N, C_out)
    assert jnp.allclose(out_f32, ref, atol=1e-5, rtol=1e-5), "f32 path mismatch"

    # Fast path: bf16 MXU operands, f32 accumulation + f32 softmax.
    out_bf16 = jax.block_until_ready(semiemb_forward(x, weight, bias))
    assert out_bf16.shape == (N, C_out)
    assert jnp.allclose(out_bf16, ref, atol=2e-2, rtol=2e-2), "bf16 path mismatch"

    # Ragged batch (N not a multiple of the row tile): exercises the partial
    # last row-block path with no wrapper-side padding of x.
    N2 = 13
    x2 = jax.random.normal(k_x2, (N2, C_in), jnp.float32)
    ref2 = reference_forward(x2, weight, bias)
    out2 = jax.block_until_ready(semiemb_apply(x2, w32, b32, co))
    assert out2.shape == (N2, C_out)
    assert jnp.allclose(out2, ref2, atol=1e-5, rtol=1e-5), "ragged-N mismatch"

    print("KERNEL_OK")
</pallas_src>

<mosaic_0001>
module attributes {stable_mosaic.version = 11 : i64} {
  func.func @_semiemb_kernel(%arg0: i32, %arg1: memref<8x32xf32, #tpu.memory_space<vmem>>, %arg2: memref<32x16xf32, #tpu.memory_space<vmem>>, %arg3: memref<1x16xf32, #tpu.memory_space<vmem>>, %arg4: memref<8x16xf32, #tpu.memory_space<vmem>>) attributes {dimension_semantics = [#tpu.dimension_semantics<parallel>], iteration_bounds = array<i64: 2>, scalar_prefetch = 0 : i64, scratch_operands = 0 : i64, tpu.core_type = #tpu.core_type<tc>, window_params = [{transform_indices = @transform_0, window_bounds = array<i64: 8, 32>}, {pipeline_mode = #tpu.pipeline_mode<synchronous>, transform_indices = @transform_1, window_bounds = array<i64: 32, 16>}, {pipeline_mode = #tpu.pipeline_mode<synchronous>, transform_indices = @transform_2, window_bounds = array<i64: 1, 16>}, {transform_indices = @transform_3, window_bounds = array<i64: 8, 16>}]} {
    %c0 = arith.constant 0 : index
    %c0_0 = arith.constant 0 : index
    %0 = vector.load %arg1[%c0, %c0_0] : memref<8x32xf32, #tpu.memory_space<vmem>>, vector<8x32xf32>
    %c0_1 = arith.constant 0 : index
    %c0_2 = arith.constant 0 : index
    %1 = vector.load %arg2[%c0_1, %c0_2] : memref<32x16xf32, #tpu.memory_space<vmem>>, vector<32x16xf32>
    %cst = arith.constant dense<0.000000e+00> : vector<8x16xf32>
    %2 = tpu.matmul %0, %1, %cst {dimension_numbers = #tpu.dot_dimension_numbers<[1], [0], [0], [1], [0, 0, 1, 1], [], []>} : vector<8x32xf32>, vector<32x16xf32>, vector<8x16xf32> -> vector<8x16xf32>
    %c0_3 = arith.constant 0 : index
    %c0_4 = arith.constant 0 : index
    %3 = vector.load %arg3[%c0_3, %c0_4] : memref<1x16xf32, #tpu.memory_space<vmem>>, vector<1x16xf32>
    %4 = vector.broadcast %3 : vector<1x16xf32> to vector<8x16xf32>
    %5 = arith.addf %2, %4 : vector<8x16xf32>
    %cst_5 = arith.constant dense<0xFF800000> : vector<8xf32>
    %6 = vector.multi_reduction <maximumf>, %5, %cst_5 [1] : vector<8x16xf32> to vector<8xf32>
    %7 = vector.shape_cast %6 : vector<8xf32> to vector<8x1xf32>
    %8 = vector.broadcast %7 : vector<8x1xf32> to vector<8x16xf32>
    %9 = arith.subf %5, %8 : vector<8x16xf32>
    %10 = math.exp %9 : vector<8x16xf32>
    %cst_6 = arith.constant dense<0.000000e+00> : vector<8xf32>
    %11 = vector.multi_reduction <add>, %10, %cst_6 [1] : vector<8x16xf32> to vector<8xf32>
    %12 = vector.shape_cast %11 : vector<8xf32> to vector<8x1xf32>
    %13 = math.log %12 : vector<8x1xf32>
    %14 = vector.broadcast %13 : vector<8x1xf32> to vector<8x16xf32>
    %15 = arith.subf %9, %14 : vector<8x16xf32>
    %c0_7 = arith.constant 0 : index
    %c0_8 = arith.constant 0 : index
    %16 = vector.load %arg4[%c0_7, %c0_8] : memref<8x16xf32, #tpu.memory_space<vmem>>, vector<8x16xf32>
    tpu.vector_store %arg4[%c0_7, %c0_8], %15 {strides = array<i32>} : memref<8x16xf32, #tpu.memory_space<vmem>>, vector<8x16xf32>,
    return
  }
  func.func @transform_0(%arg0: i32) -> (i32, i32) {
    %c0_i32 = arith.constant 0 : i32
    %c0_i32_0 = arith.constant 0 : i32
    return %arg0, %c0_i32 : i32, i32
  }
  func.func @transform_1(%arg0: i32) -> (i32, i32) {
    %c0_i32 = arith.constant 0 : i32
    %c0_i32_0 = arith.constant 0 : i32
    %c0_i32_1 = arith.constant 0 : i32
    return %c0_i32, %c0_i32_0 : i32, i32
  }
  func.func @transform_2(%arg0: i32) -> (i32, i32) {
    %c0_i32 = arith.constant 0 : i32
    %c0_i32_0 = arith.constant 0 : i32
    %c0_i32_1 = arith.constant 0 : i32
    return %c0_i32, %c0_i32_0 : i32, i32
  }
  func.func @transform_3(%arg0: i32) -> (i32, i32) {
    %c0_i32 = arith.constant 0 : i32
    %c0_i32_0 = arith.constant 0 : i32
    return %arg0, %c0_i32 : i32, i32
  }
}

</mosaic_0001>

<bundles_post_ra>
// kernel: tpu_custom_call.1
= control target key start
LH: loop header
LB: loop body
LE: loop exit
PB: predicated region body
PF: predicated region fallthrough
CT: control target
= control target key end

     0   :  { %8 = vsyncpa [#allocation3], 0  ;;  %s530_s0 = inlined_call_operand.vmem [shape: f32[16,32], index: 0, kind: input, shape index: {}]   ;;  %s531_s1 = inlined_call_operand.vmem [shape: f32[32,16], index: 1, kind: input, shape index: {}]   ;;  %s532_s2 = inlined_call_operand.vmem [shape: f32[1,16], index: 2, kind: input, shape index: {}]   ;;  %s533_s3 = inlined_call_operand.hbm [shape: f32[16,16], index: 3, kind: output, shape index: {}]  }
   0x1   :  { %10 = vsyncpa [#allocation3 + $0x1], 0  ;;  %s427_s12 = smov 0   ;;  %s429_s13 = smov 0  }
   0x2   :  { %s431_s14 = smov 0   ;;  %s433_s15 = smov 0  }
   0x3 LB: > { %s448_s16 = sadd.s32 4294967295, %s405_s15   ;;  %s288_s17 = sadd.s32 4294967294, %s405_s15   ;;  %s405_s15 = sphi %s433_s15, %s539_s15   ;;  %s401_s14 = sphi %s431_s14, %s538_s14   ;;  %s397_s13 = sphi %s429_s13, %s537_s13   ;;  %s393_s12 = sphi %s427_s12, %s536_s12  }
   0x4   : > { %s452_s18 = sadd.s32 1, %s405_s15   ;;  %s91_s19 = sadd.s32 1, %s401_s14 }
   0x5   : > { %s88_s20 = ssub.s32 %s405_s15, %s452_s18  ;;  %p101_p0 = scmp.ne.s32.totalorder %s401_s14, %s397_s13 }
   0x6   : > { %p89_p1 = scmp.eq.s32.totalorder %s88_s20, 0  ;;  %p102_p2 = scmp.eq.s32.totalorder %s448_s16, 1 }
   0x7   : > { %p107_p3 = scmp.ne.s32.totalorder %s397_s13, %s393_s12  ;;  %p108_p4 = scmp.eq.s32.totalorder %s288_s17, 1 }
   0x8   : > { %s463_s21 = scalar_select %p89_p1, %s401_s14, %s91_s19  }
   0x9   : > { %p465_p5 = por %p102_p2, %p101_p0  ;;  %p469_p6 = por %p108_p4, %p107_p3 }
   0xa   : > { %p291_p7 = scmp.ge.s32.totalorder %s405_s15, 1  ;;  %p139_p8 = scmp.lt.s32.totalorder %s405_s15, 3 }
   0xc   : > { %p140_p9 = pnand %p291_p7, %p139_p8 }
   0xd   : > { %p162_p10 = scmp.lt.s32.totalorder (!%p140_p9), %s448_s16, 1  ;;  %s159_s17 = sand.u32 (!%p140_p9), 1, %s397_s13  }
   0xe   : > { %143 = sbr.rel (%p140_p9) target bundleno = 414 (0x19e), region = 32  ;;  %s292_s19 = sshll.u32 (!%p140_p9), %s159_s17, 3 }
   0xf   : > { %s296_s20 = sshll.u32 (!%p140_p9), %s448_s16, 3  ;;  %s161_s27 = scalar_lea.vmem (!%p140_p9), [#allocation2], %s292_s19 }
  0x10   : > { %s224_s26 = scalar_lea.hbm (!%p140_p9), %s533_s3, %s296_s20  ;;  %s226_s28 = sshll.u32 (!%p140_p9), %s161_s27, 4  ;;  %s227_s28 = int_to_ptr.vmem [resolvable:$true] %s226_s28 }
  0x11   : > { %s228_s29 = sshll.u32 (!%p140_p9), %s224_s26, 4  ;;  %s363_s7 = scalar_lea.hbm (!%p140_p9), %s533_s3, 16  ;;  %s229_s29 = int_to_ptr.hbm [resolvable:$true] %s228_s29 }
  0x12   : > { %s357_s4 = sshra.s32 (!%p140_p9), %s229_s29, 4  ;;  %s358_s4 = int_to_ptr.hbm [resolvable:$true] %s357_s4 }
  0x13   : > { %v170_v0 = vld [vmem:[%s531_s1 + $0x18] sm:$0xff]  ;;  %v169_v1 = vld [vmem:[%s531_s1 + $0x10] sm:$0xff]  ;;  %v168_v2 = vld [vmem:[%s531_s1 + $0x8] sm:$0xff]  ;;  %s163_s30 = scalar_select %p162_p10, %s448_s16, 1  ;;  %vm175_vm0 = vcmask 261120   ;;  %vm199_vm1 = vcmask 130048  }
  0x14   : > { %191 = vmatpush.msra.mxu0 %v170_v0  ;;  %v167_v3 = vld [vmem:[%s531_s1] sm:$0xff]  ;;  %s359_s5 = scalar_lea.hbm %s358_s4, 8  ;;  %p364_p0 = scmp.lt.s32.totalorder %s358_s4, %s533_s3 }
  0x15   : > { %s293_s6 = sshll.u32 %s163_s30, 3  ;;  %v338_v5 = vld [vmem:[%s532_s2] ss:$0 sm:$0xff]  ;;  %s214_s30 = scalar_lea.sflag [#allocation3], %s159_s17 }
  0x16   : > { %192 = vmatpush.msra.mxu0 %v169_v1  ;;  %s165_s9 = scalar_lea.vmem %s530_s0, %s293_s6  ;;  %p360_p11 = scmp.ne.s32.totalorder %s358_s4, %s359_s5 }
  0x17   : > { %v166_v4 = vld [vmem:[%s165_s9] sm:$0xff]  ;;  %p365_p1 = scmp.lt.s32.totalorder %s363_s7, %s359_s5 }
  0x18   : > { %193 = vmatpush.msra.mxu0 %v168_v2  ;;  %p361_p12 = pnand %p360_p11, %p465_p5 }
  0x19   : > { %p366_p2 = por %p365_p1, %p364_p0 }
  0x1a   : > { %194 = vmatpush.msra.mxu0 %v167_v3  ;;  %p362_p13 = pneg %p361_p12 }
  0x1b   : > { %294 = vmatmul.msk.f32.vlgmr.msra.gmra.mxu0 %vm175_vm0, %v166_v4 }
  0x1c   : > { %p367_p3 = pnand %p366_p2, %p362_p13 }
  0x98   : > { %v196_v6 = vpop.f32.mrf.mxu0 }
  0x99   : > { %v197_v7 = vadd.f32 %v338_v5, %v196_v6 }
  0x9b   : > { %v200_v8 = vsel %vm199_vm1, %v197_v7, -inf }
  0x9c   : > { %201 = vmax.xlane.f32.xlu0 %v200_v8 }
 0x10f   : > { %v202_v9 = vpop.xlane.xlu0 %201 }
 0x110   : > { %v203_v10 = vsub.f32 %v197_v7, %v202_v9 }
 0x112   : > { %v204_v11 = vmul.f32 1.442695, %v203_v10 }
 0x114   : > { %339 = vpow2.f32 %v204_v11 }
 0x11a   : > { %v340_v12 = vpop.eup %339 }
 0x11b   : > { %v206_v13 = vsel %vm199_vm1, %v340_v12, 0.0 }
 0x11c   : > { %207 = vadd.xlane.f32.xlu0 %v206_v13 }
 0x18f   : > { %v208_v14 = vpop.xlane.xlu0 %207 }
 0x190   : > { %341 = vlog2.f32 %v208_v14 }
 0x196   : > { %v342_v15 = vpop.eup %341 }
 0x197   : > { %v210_v16 = vmul.f32 0.6931472, %v342_v15 }
 0x199   : > { %v211_v17 = vsub.f32 %v203_v10, %v210_v16 }
 0x19b   : > { %212 = vst.msk [vmem:[%s161_s27] sm:$0xff] %vm199_vm1, %v211_v17 }
 0x19c   : > { %370 = shalt.err (!%p367_p3)
}
 0x19d   : > { %299 = dma.vmem_to_hbm [thread:$0]  (%p465_p5), %s227_s28, 128, %s229_s29, %s214_s30  }
 0x19e PF: > { %p305_p4 = scmp.ge.s32.totalorder %s405_s15, 2  ;;  %s240_s10 = sand.u32 1, %s393_s12  }
 0x19f   : > { %s241_s11 = scalar_lea.sflag [#allocation3], %s240_s10 }
 0x1a0   : > { %p302_p7 = pnand %p305_p4, %p469_p6 }
 0x1a2   : > { %p303_p8 = pneg %p302_p7 }
 0x1a4   : > { %388 = dma.done.wait (%p303_p8), %s241_s11, 128  }
 0x1a5   : > { %390 = vsyncadd (%p303_p8), %s241_s11, 4294967168  ;;  %p13_p9 = scmp.ge.s32.totalorder %s452_s18, 4   ;;  %s536_s12 = smov %s397_s13 }
 0x1a6   : > { %s537_s13 = smov %s401_s14  ;;  %s538_s14 = smov %s463_s21 }
 0x1a7   : > { %s539_s15 = smov %s452_s18  ;;  %15 = sbr.rel (!%p13_p9) target bundleno = 3 (0x3), region = 67 }
 0x1ac   :  { %247 = vsyncpa [#allocation3], 1 }
 0x1ad   :  { %249 = vsyncpa [#allocation3 + $0x1], 1 }

</bundles_post_ra>
